<compile_context>
chip_gen: v7x
topology: tpu7x:2x2x1
jax: 0.10.0
libtpu: 0.0.40
codegen_flags: <defaults>
</compile_context>

<pallas_src>
import functools

import jax
import jax.numpy as jnp
import numpy as np
from jax import lax
from jax.experimental import pallas as pl
from jax.experimental.pallas import tpu as pltpu

_SUB_ROWS = 16                    # sub-slab height (sublanes); aligned to bf16 (16,128) tiling
_SUB_TOKENS = _SUB_ROWS * 128     # 2048 tokens per inner compute step


def _device_kind() -> str:
    try:
        return jax.devices()[0].device_kind.lower()
    except Exception:
        return ""


def _router_loss_kernel(logits_ref, out_ref, *, top_k: int, num_experts: int,
                        n_sub: int, token_tile: int, total_tokens: int,
                        needs_mask: bool, compute_dtype):
    """Processes one (num_experts, token_tile) logits block.

    Tokens live on the lane/sublane axes so every top-k / tie-break / softmax
    op is pure VPU elementwise work, fully unrolled over the small static
    expert axis.  The inner fori_loop walks 16x128-token sub-slabs so the vreg
    working set stays constant regardless of the (large) DMA block size.
    """
    c = pl.program_id(0)          # parallel (core) axis
    i = pl.program_id(1)          # arbitrary (token-chunk) axis

    @pl.when(i == 0)
    def _init():
        out_ref[...] = jnp.zeros_like(out_ref)

    # Sentinel that knocks a selected expert out of the next top-k round.
    # (A real logit exactly equal to this would mis-tie-break; impossible for
    # finite, sanely-scaled router logits.)
    neg = jnp.asarray(jnp.finfo(compute_dtype).min, dtype=compute_dtype)

    if needs_mask:
        blk = c * pl.num_programs(1) + i
        valid_in_block = total_tokens - blk * token_tile       # scalar per step
        local_tok = (lax.broadcasted_iota(jnp.int32, (_SUB_ROWS, 128), 0) * 128
                     + lax.broadcasted_iota(jnp.int32, (_SUB_ROWS, 128), 1))

    def body(r, acc):
        off = pl.multiple_of(r * _SUB_ROWS, _SUB_ROWS)
        # Per-expert (16,128) token slabs; compute_dtype is bf16 on chips with
        # a bf16 VPU (v6e/v7x) -> 2 elems/lane, f32 on v5e and older.
        work = [logits_ref[e, pl.ds(off, _SUB_ROWS), :].astype(compute_dtype)
                for e in range(num_experts)]

        # ---- iterative top-k over experts, fully unrolled (VPU only) ----
        sel_total = None          # sum_k sum_e one_hot(selected) == expert-mask sum
        top_vals = []
        for kk in range(top_k):
            vmax = work[0]
            for e in range(1, num_experts):
                vmax = jnp.maximum(vmax, work[e])
            top_vals.append(vmax.astype(jnp.float32))
            is_last_k = kk == top_k - 1
            taken = None
            new_work = []
            for e in range(num_experts):
                # tie-break to the smallest expert index (matches torch.topk)
                hit = work[e] == vmax
                if taken is None:
                    is_sel, taken = hit, hit
                else:
                    is_sel = jnp.logical_and(hit, jnp.logical_not(taken))
                    taken = jnp.logical_or(taken, is_sel)
                if not is_last_k:         # no knockout needed after final round
                    new_work.append(jnp.where(is_sel, neg, work[e]))
            work = new_work
            t32 = taken.astype(jnp.float32)
            sel_total = t32 if sel_total is None else sel_total + t32

        # ---- softmax over the k routing weights (f32; exp/recip on the EUP) ----
        m = top_vals[0]
        for v in top_vals[1:]:
            m = jnp.maximum(m, v)
        exps = [jnp.exp(v - m) for v in top_vals]
        s = exps[0]
        for ex in exps[1:]:
            s = s + ex
        # Softmax numerator-sum equals the denominator (deduped).  Both 1/top_k
        # means are folded into the wrapper's final scalar scaling.
        contrib = s * pl.reciprocal(s, approx=True) * sel_total

        if needs_mask:
            remaining = valid_in_block - r * _SUB_TOKENS
            contrib = jnp.where(local_tok < remaining, contrib, jnp.float32(0.0))

        # fold (16,128) -> (8,128) and accumulate
        return acc + contrib[0:8, :] + contrib[8:16, :]

    acc = lax.fori_loop(0, n_sub, body,
                        jnp.zeros((8, 128), jnp.float32), unroll=True)
    out_ref[...] = out_ref[...] + acc


def mixtral_router_loss(gate_logits_list, *, num_experts: int, top_k: int,
                        aux_loss_coef: float, token_tile: int = 16384,
                        n_par=None, transport_dtype=jnp.bfloat16,
                        compute_dtype=None,
                        vmem_input_budget: int = 16 * 1024 * 1024):
    """Pallas equivalent of MixtralRouterLoss.forward(gate_logits_list)."""
    assert 1 <= top_k <= num_experts

    kind = _device_kind()
    if n_par is None:
        # Two TensorCores only on v7x; a 2-wide "parallel" axis is pure
        # serialization on single-TC v5e/v6e.
        n_par = 2 if "v7" in kind else 1
    if compute_dtype is None:
        # bf16 top-k bookkeeping only where the VPU natively supports bf16.
        compute_dtype = jnp.bfloat16 if ("v6" in kind or "v7" in kind) else jnp.float32

    # --- single concat along the token axis (== torch.cat(dim=0)) ----------
    if len(gate_logits_list) == 1:
        logits = gate_logits_list[0]
    else:
        logits = jnp.concatenate(gate_logits_list, axis=0)      # [T, E]
    t_total, e = logits.shape
    assert e == num_experts

    # --- token-tile selection (big DMA blocks, step overhead amortized) ----
    quantum = _SUB_TOKENS
    itemsize = jnp.dtype(transport_dtype).itemsize
    per_core = -(-t_total // n_par)
    target_by_steps = max(per_core // 4, quantum)       # aim for >=~4 steps/core
    max_by_vmem = max(vmem_input_budget // (2 * num_experts * itemsize), quantum)
    tile = min(int(token_tile), target_by_steps, max_by_vmem)
    tile = max(quantum, (tile // quantum) * quantum)
    rt = tile // 128
    n_steps = max(1, -(-t_total // (n_par * tile)))
    t_pad = n_par * n_steps * tile
    needs_mask = t_pad != t_total

    # --- one relayout pass: cast -> pad -> transpose (bf16 over HBM); the
    # final minor-dim split reshape is layout-preserving (no extra copy). -----
    x = logits.astype(transport_dtype)
    if t_pad != t_total:
        x = jnp.pad(x, ((0, t_pad - t_total), (0, 0)))
    x3 = jnp.transpose(x).reshape(num_experts, t_pad // 128, 128)

    kernel = functools.partial(
        _router_loss_kernel, top_k=top_k, num_experts=num_experts,
        n_sub=rt // _SUB_ROWS, token_tile=tile, total_tokens=t_total,
        needs_mask=needs_mask, compute_dtype=compute_dtype)

    cost = pl.CostEstimate(
        flops=t_pad * num_experts * (5 * top_k + 4),
        transcendentals=t_pad * (top_k + 1),
        bytes_accessed=t_pad * num_experts * itemsize + n_par * 8 * 128 * 4)

    partials = pl.pallas_call(
        kernel,
        out_shape=jax.ShapeDtypeStruct((n_par * 8, 128), jnp.float32),
        grid_spec=pltpu.PrefetchScalarGridSpec(
            num_scalar_prefetch=0,
            grid=(n_par, n_steps),
            in_specs=[pl.BlockSpec((num_experts, rt, 128),
                                   lambda c, i: (0, c * n_steps + i, 0))],
            out_specs=pl.BlockSpec((8, 128), lambda c, i: (c, 0)),
        ),
        compiler_params=pltpu.CompilerParams(
            dimension_semantics=("parallel", "arbitrary")),
        cost_estimate=cost,
    )(x3)

    # Scalar epilogue: both 1/top_k means, the global mean over (tokens,
    # experts) and the aux_loss_coef * num_experts**2 scaling, in one constant.
    total = jnp.sum(partials)
    scale = aux_loss_coef * num_experts / (t_total * top_k * top_k)
    return jnp.float32(scale) * total


def _reference_loss(gate_logits_list, num_experts, top_k, coef):
    # Pure-JAX reference mirroring the PyTorch code.
    logits = jnp.concatenate(gate_logits_list, axis=0)
    vals, sel = jax.lax.top_k(logits, top_k)
    rw = jax.nn.softmax(vals, axis=-1)
    mask = jax.nn.one_hot(sel, num_experts, dtype=jnp.float32)   # [T, k, E]
    tokens_per = jnp.mean(mask, axis=-2)                         # [T, E]
    rp = jnp.mean(rw, axis=-1)                                   # [T]
    return coef * jnp.mean(tokens_per * rp[:, None]) * num_experts ** 2


if __name__ == "__main__":
    # MixConfig-equivalent constants (deterministic, in-script).
    NUM_EXPERTS = 4
    TOP_K = 2
    AUX_LOSS_COEF = 0.001

    # gate_logits: list of per-layer router logits, each [batch*seq, num_experts]
    batch, seq, num_layers = 2, 8, 2
    tokens_per_layer = batch * seq
    key = jax.random.PRNGKey(0)
    keys = jax.random.split(key, num_layers + 1)
    gate_logits = [
        jax.random.normal(k, (tokens_per_layer, NUM_EXPERTS), dtype=jnp.float32)
        for k in keys[:num_layers]
    ]

    loss = jax.block_until_ready(mixtral_router_loss(
        gate_logits, num_experts=NUM_EXPERTS, top_k=TOP_K,
        aux_loss_coef=AUX_LOSS_COEF))
    ref = jax.block_until_ready(
        _reference_loss(gate_logits, NUM_EXPERTS, TOP_K, AUX_LOSS_COEF))
    assert np.isfinite(float(loss))
    # rtol covers the approximate-reciprocal softmax denominator in the kernel.
    np.testing.assert_allclose(np.asarray(loss), np.asarray(ref),
                               rtol=2e-3, atol=1e-7)

    # Second check: multi-step grid, multi-sub-slab inner loop and a ragged
    # padded tail (exercises the resident accumulator + final-block mask).
    gate_logits2 = [
        jax.random.normal(keys[-1], (24604, NUM_EXPERTS), dtype=jnp.float32)]
    loss2 = jax.block_until_ready(mixtral_router_loss(
        gate_logits2, num_experts=NUM_EXPERTS, top_k=TOP_K,
        aux_loss_coef=AUX_LOSS_COEF))
    ref2 = jax.block_until_ready(
        _reference_loss(gate_logits2, NUM_EXPERTS, TOP_K, AUX_LOSS_COEF))
    np.testing.assert_allclose(np.asarray(loss2), np.asarray(ref2),
                               rtol=2e-3, atol=1e-7)

    print("KERNEL_OK")
</pallas_src>

<mosaic_0001>
module attributes {stable_mosaic.version = 11 : i64} {
  func.func @_router_loss_kernel(%arg0: i32, %arg1: i32, %arg2: memref<4x16x128xbf16, #tpu.memory_space<vmem>>, %arg3: memref<8x128xf32, #tpu.memory_space<vmem>>) attributes {dimension_semantics = [#tpu.dimension_semantics<parallel>, #tpu.dimension_semantics<arbitrary>], iteration_bounds = array<i64: 1, 1>, scalar_prefetch = 0 : i64, scratch_operands = 0 : i64, tpu.core_type = #tpu.core_type<tc>, window_params = [{transform_indices = @transform_0, window_bounds = array<i64: 4, 16, 128>}, {transform_indices = @transform_1, window_bounds = array<i64: 8, 128>}]} {
    %c0_i32 = arith.constant 0 : i32
    %0 = arith.cmpi eq, %arg1, %c0_i32 : i32
    %1 = arith.extui %0 : i1 to i32
    %c0_i32_0 = arith.constant 0 : i32
    %2 = arith.cmpi ne, %1, %c0_i32_0 : i32
    scf.if %2 {
      %cst_20 = arith.constant 0.000000e+00 : f32
      %98 = vector.broadcast %cst_20 : f32 to vector<8x128xf32>
      %c0_21 = arith.constant 0 : index
      %c0_22 = arith.constant 0 : index
      %99 = vector.load %arg3[%c0_21, %c0_22] : memref<8x128xf32, #tpu.memory_space<vmem>>, vector<8x128xf32>
      tpu.vector_store %arg3[%c0_21, %c0_22], %98 {strides = array<i32>} : memref<8x128xf32, #tpu.memory_space<vmem>>, vector<8x128xf32>,
    } else {
    }
    %c1_i32 = arith.constant 1 : i32
    %3 = arith.muli %arg0, %c1_i32 : i32
    %4 = arith.addi %3, %arg1 : i32
    %c2048_i32 = arith.constant 2048 : i32
    %5 = arith.muli %4, %c2048_i32 : i32
    %c32_i32 = arith.constant 32 : i32
    %6 = arith.subi %c32_i32, %5 : i32
    %7 = tpu.iota {dimensions = array<i32: 0>} : vector<16x128xi32>
    %c128_i32 = arith.constant 128 : i32
    %8 = vector.broadcast %c128_i32 : i32 to vector<16x128xi32>
    %9 = arith.muli %7, %8 : vector<16x128xi32>
    %10 = tpu.iota {dimensions = array<i32: 1>} : vector<16x128xi32>
    %11 = arith.addi %9, %10 : vector<16x128xi32>
    %cst = arith.constant 0.000000e+00 : f32
    %12 = vector.broadcast %cst : f32 to vector<8x128xf32>
    %cst_1 = arith.constant -3.40282347E+38 : f32
    %c0_i32_2 = arith.constant 0 : i32
    %c16_i32 = arith.constant 16 : i32
    %13 = arith.muli %c0_i32_2, %c16_i32 : i32
    %14 = tpu.assume_multiple %13, 16 : i32
    %c0 = arith.constant 0 : index
    %15 = arith.index_cast %14 : i32 to index
    %c0_3 = arith.constant 0 : index
    %16 = vector.load %arg2[%c0, %15, %c0_3] : memref<4x16x128xbf16, #tpu.memory_space<vmem>>, vector<1x16x128xbf16>
    %17 = vector.shape_cast %16 : vector<1x16x128xbf16> to vector<16x128xbf16>
    %18 = arith.extf %17 : vector<16x128xbf16> to vector<16x128xf32>
    %c1 = arith.constant 1 : index
    %19 = arith.index_cast %14 : i32 to index
    %c0_4 = arith.constant 0 : index
    %20 = vector.load %arg2[%c1, %19, %c0_4] : memref<4x16x128xbf16, #tpu.memory_space<vmem>>, vector<1x16x128xbf16>
    %21 = vector.shape_cast %20 : vector<1x16x128xbf16> to vector<16x128xbf16>
    %22 = arith.extf %21 : vector<16x128xbf16> to vector<16x128xf32>
    %c2 = arith.constant 2 : index
    %23 = arith.index_cast %14 : i32 to index
    %c0_5 = arith.constant 0 : index
    %24 = vector.load %arg2[%c2, %23, %c0_5] : memref<4x16x128xbf16, #tpu.memory_space<vmem>>, vector<1x16x128xbf16>
    %25 = vector.shape_cast %24 : vector<1x16x128xbf16> to vector<16x128xbf16>
    %26 = arith.extf %25 : vector<16x128xbf16> to vector<16x128xf32>
    %c3 = arith.constant 3 : index
    %27 = arith.index_cast %14 : i32 to index
    %c0_6 = arith.constant 0 : index
    %28 = vector.load %arg2[%c3, %27, %c0_6] : memref<4x16x128xbf16, #tpu.memory_space<vmem>>, vector<1x16x128xbf16>
    %29 = vector.shape_cast %28 : vector<1x16x128xbf16> to vector<16x128xbf16>
    %30 = arith.extf %29 : vector<16x128xbf16> to vector<16x128xf32>
    %31 = arith.maximumf %18, %22 : vector<16x128xf32>
    %32 = arith.maximumf %31, %26 : vector<16x128xf32>
    %33 = arith.maximumf %32, %30 : vector<16x128xf32>
    %34 = arith.cmpf oeq, %18, %33 : vector<16x128xf32>
    %35 = vector.broadcast %cst_1 : f32 to vector<16x128xf32>
    %36 = arith.select %34, %35, %18 : vector<16x128xi1>, vector<16x128xf32>
    %37 = arith.cmpf oeq, %22, %33 : vector<16x128xf32>
    %cst_7 = arith.constant dense<true> : vector<16x128xi1>
    %38 = arith.xori %34, %cst_7 : vector<16x128xi1>
    %39 = arith.andi %37, %38 : vector<16x128xi1>
    %40 = arith.ori %34, %39 : vector<16x128xi1>
    %41 = vector.broadcast %cst_1 : f32 to vector<16x128xf32>
    %42 = arith.select %39, %41, %22 : vector<16x128xi1>, vector<16x128xf32>
    %43 = arith.cmpf oeq, %26, %33 : vector<16x128xf32>
    %cst_8 = arith.constant dense<true> : vector<16x128xi1>
    %44 = arith.xori %40, %cst_8 : vector<16x128xi1>
    %45 = arith.andi %43, %44 : vector<16x128xi1>
    %46 = arith.ori %40, %45 : vector<16x128xi1>
    %47 = vector.broadcast %cst_1 : f32 to vector<16x128xf32>
    %48 = arith.select %45, %47, %26 : vector<16x128xi1>, vector<16x128xf32>
    %49 = arith.cmpf oeq, %30, %33 : vector<16x128xf32>
    %cst_9 = arith.constant dense<true> : vector<16x128xi1>
    %50 = arith.xori %46, %cst_9 : vector<16x128xi1>
    %51 = arith.andi %49, %50 : vector<16x128xi1>
    %52 = arith.ori %46, %51 : vector<16x128xi1>
    %53 = vector.broadcast %cst_1 : f32 to vector<16x128xf32>
    %54 = arith.select %51, %53, %30 : vector<16x128xi1>, vector<16x128xf32>
    %55 = arith.extui %52 : vector<16x128xi1> to vector<16x128xi32>
    %56 = arith.sitofp %55 : vector<16x128xi32> to vector<16x128xf32>
    %57 = arith.maximumf %36, %42 : vector<16x128xf32>
    %58 = arith.maximumf %57, %48 : vector<16x128xf32>
    %59 = arith.maximumf %58, %54 : vector<16x128xf32>
    %60 = arith.cmpf oeq, %36, %59 : vector<16x128xf32>
    %61 = arith.cmpf oeq, %42, %59 : vector<16x128xf32>
    %cst_10 = arith.constant dense<true> : vector<16x128xi1>
    %62 = arith.xori %60, %cst_10 : vector<16x128xi1>
    %63 = arith.andi %61, %62 : vector<16x128xi1>
    %64 = arith.ori %60, %63 : vector<16x128xi1>
    %65 = arith.cmpf oeq, %48, %59 : vector<16x128xf32>
    %cst_11 = arith.constant dense<true> : vector<16x128xi1>
    %66 = arith.xori %64, %cst_11 : vector<16x128xi1>
    %67 = arith.andi %65, %66 : vector<16x128xi1>
    %68 = arith.ori %64, %67 : vector<16x128xi1>
    %69 = arith.cmpf oeq, %54, %59 : vector<16x128xf32>
    %cst_12 = arith.constant dense<true> : vector<16x128xi1>
    %70 = arith.xori %68, %cst_12 : vector<16x128xi1>
    %71 = arith.andi %69, %70 : vector<16x128xi1>
    %72 = arith.ori %68, %71 : vector<16x128xi1>
    %73 = arith.extui %72 : vector<16x128xi1> to vector<16x128xi32>
    %74 = arith.sitofp %73 : vector<16x128xi32> to vector<16x128xf32>
    %75 = arith.addf %56, %74 : vector<16x128xf32>
    %76 = arith.maximumf %33, %59 : vector<16x128xf32>
    %77 = arith.subf %33, %76 : vector<16x128xf32>
    %78 = math.exp %77 : vector<16x128xf32>
    %79 = arith.subf %59, %76 : vector<16x128xf32>
    %80 = math.exp %79 : vector<16x128xf32>
    %81 = arith.addf %78, %80 : vector<16x128xf32>
    %82 = tpu.reciprocal %81 {approx = true} : vector<16x128xf32> -> vector<16x128xf32>
    %83 = arith.mulf %81, %82 : vector<16x128xf32>
    %84 = arith.mulf %83, %75 : vector<16x128xf32>
    %c2048_i32_13 = arith.constant 2048 : i32
    %85 = arith.muli %c0_i32_2, %c2048_i32_13 : i32
    %86 = arith.subi %6, %85 : i32
    %87 = vector.broadcast %86 : i32 to vector<16x128xi32>
    %88 = arith.cmpi slt, %11, %87 : vector<16x128xi32>
    %cst_14 = arith.constant 0.000000e+00 : f32
    %89 = vector.broadcast %cst_14 : f32 to vector<16x128xf32>
    %90 = arith.select %88, %84, %89 : vector<16x128xi1>, vector<16x128xf32>
    %91 = vector.extract_strided_slice %90 {offsets = [0, 0], sizes = [8, 128], strides = [1, 1]} : vector<16x128xf32> to vector<8x128xf32>
    %92 = arith.addf %12, %91 : vector<8x128xf32>
    %93 = vector.extract_strided_slice %90 {offsets = [8, 0], sizes = [8, 128], strides = [1, 1]} : vector<16x128xf32> to vector<8x128xf32>
    %94 = arith.addf %92, %93 : vector<8x128xf32>
    %c1_i32_15 = arith.constant 1 : i32
    %c0_16 = arith.constant 0 : index
    %c0_17 = arith.constant 0 : index
    %95 = vector.load %arg3[%c0_16, %c0_17] : memref<8x128xf32, #tpu.memory_space<vmem>>, vector<8x128xf32>
    %96 = arith.addf %95, %94 : vector<8x128xf32>
    %c0_18 = arith.constant 0 : index
    %c0_19 = arith.constant 0 : index
    %97 = vector.load %arg3[%c0_18, %c0_19] : memref<8x128xf32, #tpu.memory_space<vmem>>, vector<8x128xf32>
    tpu.vector_store %arg3[%c0_18, %c0_19], %96 {strides = array<i32>} : memref<8x128xf32, #tpu.memory_space<vmem>>, vector<8x128xf32>,
    return
  }
  func.func @transform_0(%arg0: i32, %arg1: i32) -> (i32, i32, i32) {
    %c1_i32 = arith.constant 1 : i32
    %0 = arith.muli %arg0, %c1_i32 : i32
    %1 = arith.addi %0, %arg1 : i32
    %c0_i32 = arith.constant 0 : i32
    %c0_i32_0 = arith.constant 0 : i32
    %c0_i32_1 = arith.constant 0 : i32
    return %c0_i32, %1, %c0_i32_0 : i32, i32, i32
  }
  func.func @transform_1(%arg0: i32, %arg1: i32) -> (i32, i32) {
    %c0_i32 = arith.constant 0 : i32
    %c0_i32_0 = arith.constant 0 : i32
    return %arg0, %c0_i32 : i32, i32
  }
}

</mosaic_0001>

<bundles_post_ra>
// kernel: tpu_custom_call.1
= control target key start
LH: loop header
LB: loop body
LE: loop exit
PB: predicated region body
PF: predicated region fallthrough
CT: control target
= control target key end

     0   :  { %6 = vsyncpa [#allocation3], 0  ;;  %s461_s0 = inlined_call_operand.hbm [shape: bf16[4,16,128], index: 0, kind: input, shape index: {}]   ;;  %s462_s1 = inlined_call_operand.hbm [shape: f32[8,128], index: 1, kind: output, shape index: {}]  }
   0x1   :  { %7 = vsyncpa [#allocation4], 0  ;;  %s289_s6 = smov [#allocation2]   ;;  %s241_s10 = scalar_lea.hbm %s461_s0, 512 }
   0x2   :  { %s17_s7 = sshll.u32 %s289_s6, 4  ;;  %p242_p0 = scmp.ne.s32.totalorder %s461_s0, %s241_s10  ;;  %s18_s7 = int_to_ptr.vmem [resolvable:$true] %s17_s7 }
   0x3   :  { %p245_p1 = scmp.lt.u32.totalorder %s241_s10, %s461_s0 }
   0x5   :  { %p247_p2 = pnand %p245_p1, %p242_p0 }
   0x7   :  { %250 = shalt.err (!%p247_p2)
}
   0x8   :  { %s251_s15 = scalar_lea.vmem %s18_s7, 512  ;;  %p256_p4 = scmp.lt.s32.totalorder %s18_s7, %s18_s7 }
   0x9   :  { %p252_p3 = scmp.ne.s32.totalorder %s18_s7, %s251_s15  ;;  %p257_p5 = scmp.lt.s32.totalorder %s251_s15, %s251_s15 }
   0xb   :  { %p258_p6 = por %p257_p5, %p256_p4 }
   0xd   :  { %p259_p7 = pnand %p258_p6, %p252_p3 }
   0xf   :  { %262 = shalt.err (!%p259_p7)
}
  0x10   :  { %s290_s16 = smov 64   ;;  %s291_s17 = smov 4  }
  0x11   :  { %23 = dma.hbm_to_vmem [thread:$0]  %s461_s0, 512, %s18_s7, [#allocation3], %s290_s16, %s290_s16, %s291_s17  }
  0x12   :  { %285 = dma.done.wait [#allocation3], 512  }
  0x13   :  { %286 = vsyncadd [#allocation3], 4294966784  ;;  %v208_v0 = vld [vmem:[#allocation2] sm:$0xff]   ;;  %v212_v1 = vld [vmem:[#allocation2 + $0x8] sm:$0xff]   ;;  %vm466_vm4 = vmmov 1   ;;  %v477_v20 = vmov 0  ;;  %v37_v52 = vlaneseq }
  0x14   :  { %v216_v2 = vld [vmem:[#allocation2 + $0x10] sm:$0xff]   ;;  %v209_v3 = vunpack.c.l.bf16 %v208_v0  ;;  %v210_v4 = vunpack.c.h.bf16 %v208_v0  ;;  %v213_v5 = vunpack.c.l.bf16 %v212_v1  ;;  %v214_v6 = vunpack.c.h.bf16 %v212_v1  ;;  %v220_v7 = vld [vmem:[#allocation2 + $0x18] sm:$0xff]   ;;  %s294_s0 = smov [#allocation5]  }
  0x15   :  { %v217_v8 = vunpack.c.l.bf16 %v216_v2  ;;  %v218_v9 = vunpack.c.h.bf16 %v216_v2  ;;  %v221_v10 = vunpack.c.l.bf16 %v220_v7  ;;  %v222_v11 = vunpack.c.h.bf16 %v220_v7  ;;  %s191_s20 = sshll.u32 %s294_s0, 4  ;;  %s192_s20 = int_to_ptr.vmem [resolvable:$true] %s191_s20 }
  0x16   :  { %v71_v12 = vmax.f32 %v209_v3, %v213_v5  ;;  %v72_v13 = vmax.f32 %v210_v4, %v214_v6  ;;  %v481_v26 = vmov 0  ;;  %v487_v48 = vmov 0  ;;  %s263_s21 = scalar_lea.vmem %s192_s20, 128  ;;  %p268_p9 = scmp.lt.s32.totalorder %s192_s20, %s192_s20 }
  0x17   :  { %v489_v49 = vmov 0  ;;  %v492_v50 = vmov 0  ;;  %v494_v51 = vmov 0  ;;  %v38_v56 = vshrl.u32 %v37_v52, 7  ;;  %p264_p8 = scmp.ne.s32.totalorder %s192_s20, %s263_s21  ;;  %p269_p10 = scmp.lt.s32.totalorder %s263_s21, %s263_s21 }
  0x18   :  { %v73_v14 = vmax.f32 %v71_v12, %v217_v8  ;;  %v74_v15 = vmax.f32 %v72_v13, %v218_v9  ;;  %v43_v62 = vand.u32 127, %v37_v52  ;;  %v293_v0 = vmov 0.0  }
  0x19   :  { %v39_v60 = vadd.s32 8, %v38_v56  ;;  %v40_v61 = vmul.u32 128, %v38_v56  ;;  %p270_p11 = por %p269_p10, %p268_p9 }
  0x1a   :  { %v75_v16 = vmax.f32 %v73_v14, %v221_v10  ;;  %v76_v17 = vmax.f32 %v74_v15, %v222_v11 }
  0x1b   :  { %v41_v63 = vmul.u32 128, %v39_v60  ;;  %p271_p12 = pnand %p270_p11, %p264_p8 }
  0x1c   :  { %vm77_vm0 = vcmp.eq.f32.partialorder %v209_v3, %v75_v16  ;;  %vm78_vm1 = vcmp.eq.f32.partialorder %v210_v4, %v76_v17  ;;  %vm81_vm2 = vcmp.eq.f32.partialorder %v213_v5, %v75_v16  ;;  %vm82_vm3 = vcmp.eq.f32.partialorder %v214_v6, %v76_v17 }
  0x1d   :  { %vm83_vm5 = vmxor %vm77_vm0, %vm466_vm4  ;;  %v79_v19 = vsel %vm77_vm0, -3.4028235e+38, %v209_v3  ;;  %vm91_vm11 = vcmp.eq.f32.partialorder %v217_v8, %v75_v16  ;;  %v80_v22 = vsel %vm78_vm1, -3.4028235e+38, %v210_v4  ;;  %vm92_vm12 = vcmp.eq.f32.partialorder %v218_v9, %v76_v17 }
  0x1e   :  { %vm84_vm6 = vmxor %vm78_vm1, %vm466_vm4 }
  0x1f   :  { %vm85_vm7 = vmand %vm81_vm2, %vm83_vm5  ;;  %vm102_vm5 = vcmp.eq.f32.partialorder %v222_v11, %v76_v17 }
  0x20   :  { %vm86_vm8 = vmand %vm82_vm3, %vm84_vm6  ;;  %v89_v21 = vsel %vm85_vm7, -3.4028235e+38, %v213_v5  ;;  %vm101_vm3 = vcmp.eq.f32.partialorder %v221_v10, %v75_v16  ;;  %v44_v5 = vadd.s32 %v43_v62, %v40_v61 }
  0x21   :  { %vm319_vm9 = vmor %vm77_vm0, %vm85_vm7  ;;  %v90_v23 = vsel %vm86_vm8, -3.4028235e+38, %v214_v6  ;;  %v115_v25 = vmax.f32 %v79_v19, %v89_v21  ;;  %v45_v6 = vadd.s32 %v43_v62, %v41_v63 }
  0x22   :  { %vm323_vm10 = vmor %vm78_vm1, %vm86_vm8  ;;  %v116_v28 = vmax.f32 %v80_v22, %v90_v23 }
  0x23   :  { %v478_v20 = vsel %vm323_vm10, 4294967295, %v477_v20  ;;  %vm93_vm13 = vmxor %vm319_vm9, %vm466_vm4 }
  0x24   :  { %vm94_vm14 = vmxor %vm323_vm10, %vm466_vm4 }
  0x25   :  { %vm333_vm15 = vmand %vm91_vm11, %vm93_vm13 }
  0x26   :  { %vm337_vm0 = vmand %vm92_vm12, %vm94_vm14  ;;  %v99_v27 = vsel %vm333_vm15, -3.4028235e+38, %v217_v8 }
  0x27   :  { %v482_v26 = vsel %vm337_vm0, 4294967295, %v481_v26  ;;  %vm464_vm1 = vmor %vm319_vm9, %vm333_vm15  ;;  %v100_v29 = vsel %vm337_vm0, -3.4028235e+38, %v218_v9  ;;  %v117_v30 = vmax.f32 %v115_v25, %v99_v27 }
  0x28   :  { %vm463_vm2 = vmor %vm323_vm10, %vm337_vm0  ;;  %v118_v31 = vmax.f32 %v116_v28, %v100_v29 }
  0x29   :  { %vm103_vm6 = vmxor %vm464_vm1, %vm466_vm4 }
  0x2a   :  { %vm104_vm7 = vmxor %vm463_vm2, %vm466_vm4 }
  0x2b   :  { %vm365_vm8 = vmand %vm101_vm3, %vm103_vm6 }
  0x2c   :  { %vm369_vm11 = vmand %vm102_vm5, %vm104_vm7  ;;  %v109_v34 = vsel %vm365_vm8, -3.4028235e+38, %v221_v10 }
  0x2d   :  { %v110_v35 = vsel %vm369_vm11, -3.4028235e+38, %v222_v11  ;;  %v119_v36 = vmax.f32 %v117_v30, %v109_v34  ;;  %vm496_vm10 = vmor %vm319_vm9, %vm333_vm15 }
  0x2e   :  { %v120_v37 = vmax.f32 %v118_v31, %v110_v35 }
  0x2f   :  { %vm121_vm12 = vcmp.eq.f32.partialorder %v79_v19, %v119_v36  ;;  %vm123_vm14 = vcmp.eq.f32.partialorder %v89_v21, %v119_v36  ;;  %v153_v38 = vmax.f32 %v75_v16, %v119_v36 }
  0x30   :  { %vm122_vm13 = vcmp.eq.f32.partialorder %v80_v22, %v120_v37  ;;  %vm125_vm3 = vmxor %vm121_vm12, %vm466_vm4  ;;  %v154_v39 = vmax.f32 %v76_v17, %v120_v37  ;;  %vm124_vm5 = vcmp.eq.f32.partialorder %v90_v23, %v120_v37 }
  0x31   :  { %vm126_vm6 = vmxor %vm122_vm13, %vm466_vm4  ;;  %v155_v40 = vsub.f32 %v75_v16, %v153_v38  ;;  %v161_v42 = vsub.f32 %v119_v36, %v153_v38  ;;  %vm131_vm4 = vcmp.eq.f32.partialorder %v99_v27, %v119_v36 }
  0x32   :  { %v156_v41 = vsub.f32 %v76_v17, %v154_v39  ;;  %v162_v43 = vsub.f32 %v120_v37, %v154_v39  ;;  %vm127_vm7 = vmand %vm123_vm14, %vm125_vm3  ;;  %vm491_vm14 = vmmov 1  }
  0x33   :  { %vm128_vm2 = vmand %vm124_vm5, %vm126_vm6  ;;  %v157_v44 = vmul.f32 1.442695, %v155_v40  ;;  %v163_v46 = vmul.f32 1.442695, %v161_v42  ;;  %vm132_vm5 = vcmp.eq.f32.partialorder %v100_v29, %v120_v37 }
  0x34   :  { %v159_v45 = vmul.f32 1.442695, %v156_v41  ;;  %v165_v47 = vmul.f32 1.442695, %v162_v43  ;;  %vm382_vm1 = vmor %vm121_vm12, %vm127_vm7 }
  0x35   :  { %v488_v48 = vsel %vm382_vm1, 4294967295, %v487_v48  ;;  %229 = vpow2.f32 %v157_v44  ;;  %vm387_vm0 = vmor %vm122_vm13, %vm128_vm2 }
  0x36   :  { %v490_v49 = vsel %vm387_vm0, 4294967295, %v489_v49  ;;  %231 = vpow2.f32 %v159_v45  ;;  %vm133_vm3 = vmxor %vm382_vm1, %vm491_vm14  ;;  %vm500_vm9 = vnez %v488_v48 }
  0x37   :  { %233 = vpow2.f32 %v163_v46  ;;  %vm134_vm12 = vmxor %vm387_vm0, %vm491_vm14 }
  0x38   :  { %235 = vpow2.f32 %v165_v47  ;;  %vm397_vm6 = vmand %vm131_vm4, %vm133_vm3  ;;  %vm139_vm4 = vcmp.eq.f32.partialorder %v109_v34, %v119_v36 }
  0x39   :  { %v493_v50 = vsel %vm397_vm6, 4294967295, %v492_v50  ;;  %vm401_vm2 = vmand %vm132_vm5, %vm134_vm12  ;;  %vm140_vm5 = vcmp.eq.f32.partialorder %v110_v35, %v120_v37 }
  0x3a   :  { %v495_v51 = vsel %vm401_vm2, 4294967295, %v494_v51  ;;  %vm470_vm13 = vmor %vm382_vm1, %vm397_vm6  ;;  %vm501_vm15 = vnez %v493_v50 }
  0x3b   :  { %vm473_vm7 = vmor %vm387_vm0, %vm401_vm2  ;;  %vm497_vm2 = vnez %v478_v20 }
  0x3c   :  { %vm141_vm3 = vmxor %vm470_vm13, %vm491_vm14 }
  0x3d   :  { %vm142_vm12 = vmxor %vm473_vm7, %vm491_vm14  ;;  %vm498_vm14 = vnez %v482_v26 }
  0x3e   :  { %vm107_vm6 = vmor %vm496_vm10, %vm365_vm8 }
  0x3f   :  { %v230_v53 = vpop.eup %229  ;;  %vm143_vm13 = vmand %vm139_vm4, %vm141_vm3  ;;  %vm503_vm4 = vnez %v490_v49  ;;  %vm504_vm3 = vnez %v495_v51  ;;  %v203_v1 = vsel %vm107_vm6, 1.0, %v293_v0 }
  0x40   :  { %v232_v54 = vpop.eup %231  ;;  %vm144_vm1 = vmand %vm140_vm5, %vm142_vm12 }
  0x41   :  { %v234_v55 = vpop.eup %233  ;;  %vm499_vm7 = vmor %vm497_vm2, %vm498_vm14  ;;  %vm177_vm2 = vcmp.lt.s32.totalorder %v45_v6, 32 }
  0x42   :  { %v236_v57 = vpop.eup %235  ;;  %v167_v58 = vadd.f32 %v234_v55, %v230_v53  ;;  %vm108_vm0 = vmor %vm499_vm7, %vm369_vm11  ;;  %vm176_vm11 = vcmp.lt.s32.totalorder %v44_v5, 32 }
  0x43   :  { %v168_v59 = vadd.f32 %v236_v57, %v232_v54  ;;  %vm502_vm8 = vmor %vm500_vm9, %vm501_vm15  ;;  %v204_v3 = vsel %vm108_vm0, 1.0, %v293_v0 }
  0x44   :  { %237 = vrcp.f32 %v167_v58  ;;  %vm145_vm10 = vmor %vm502_vm8, %vm143_vm13 }
  0x45   :  { %239 = vrcp.f32 %v168_v59  ;;  %vm505_vm5 = vmor %vm503_vm4, %vm504_vm3  ;;  %v205_v2 = vsel %vm145_vm10, 1.0, %v293_v0 }
  0x46   :  { %vm146_vm12 = vmor %vm505_vm5, %vm144_vm1  ;;  %v151_v7 = vadd.f32 %v205_v2, %v203_v1 }
  0x47   :  { %v206_v4 = vsel %vm146_vm12, 1.0, %v293_v0 }
  0x48   :  { %v152_v9 = vadd.f32 %v206_v4, %v204_v3 }
  0x4e   :  { %v238_v8 = vpop.eup %237 }
  0x4f   :  { %v240_v10 = vpop.eup %239  ;;  %v171_v11 = vmul.f32 %v238_v8, %v167_v58 }
  0x50   :  { %v172_v12 = vmul.f32 %v240_v10, %v168_v59 }
  0x51   :  { %v173_v13 = vmul.f32 %v171_v11, %v151_v7 }
  0x52   :  { %v174_v14 = vmul.f32 %v172_v12, %v152_v9 }
  0x53   :  { %v178_v15 = vsel %vm176_vm11, %v173_v13, 0.0 }
  0x54   :  { %v179_v16 = vsel %vm177_vm2, %v174_v14, 0.0 }
  0x55   :  { %v181_v17 = vadd.f32 %v179_v16, %v178_v15 }
  0x57   :  { %184 = vst [vmem:[#allocation5] sm:$0xff] %v181_v17 }
  0x58   :  { %274 = shalt.err (!%p271_p12)
}
  0x59   :  { %s275_s24 = scalar_lea.hbm %s462_s1, 128 }
  0x5a   :  { %p276_p13 = scmp.ne.s32.totalorder %s462_s1, %s275_s24  ;;  %p279_p0 = scmp.lt.u32.totalorder %s275_s24, %s462_s1 }
  0x5c   :  { %p281_p1 = pnand %p279_p0, %p276_p13 }
  0x5e   :  { %284 = shalt.err (!%p281_p1)
}
  0x5f   :  { %194 = dma.vmem_to_hbm [thread:$0]  %s192_s20, 128, %s462_s1, [#allocation4]  }
  0x60   :  { %287 = dma.done.wait [#allocation4], 128  }
  0x61   :  { %288 = vsyncadd [#allocation4], 4294967168 }
  0x62   :  { %198 = vsyncpa [#allocation3], 1 }
  0x63   :  { %199 = vsyncpa [#allocation4], 1 }

</bundles_post_ra>
